<compile_context>
chip_gen: v6e
topology: v6e:2x2x1
jax: 0.10.0
libtpu: 0.0.40
codegen_flags: <defaults>
</compile_context>

<pallas_src>
import jax
import jax.numpy as jnp
from jax.experimental import pallas as pl
from jax.experimental.pallas import tpu as pltpu


def _conv_block_kernel(x_ref, b1_ref, s1_ref, b2_ref, s2_ref, o_ref, xp1, xp2):
    # x_ref:  (1, H, W*Cin)   bf16, one image, channels minor within each row
    # b1_ref: (3, W*Cin, W*Cout) bf16 banded weights (BN scale folded), stage 1
    # s1_ref: (1, W*Cout)     f32 folded bias+BN shift tiled over W, stage 1
    # b2_ref: (3, W*Cout, W*Cout) bf16 banded weights, stage 2
    # s2_ref: (1, W*Cout)     f32 shift, stage 2
    # o_ref:  (1, H, W*Cout)  f32 output rows (lane dense)
    # xp1:    (H+2, W*Cin)    f32 scratch: input with 2-row zero halo
    # xp2:    (H+2, W*Cout)   f32 scratch: stage-1 activation with zero halo
    H = x_ref.shape[1]

    # ---------------- stage 1: conv3x3 (+folded bias/BN) + ReLU -------------
    xp1[...] = jnp.zeros_like(xp1)              # zero halo rows (H padding)
    xp1[1:H + 1, :] = x_ref[0].astype(xp1.dtype)

    # One matmul per kernel row dy; W padding is inside the banded weights.
    acc = jnp.dot(x_ref[0], b1_ref[1],           # center row (dy=1), already bf16
                  preferred_element_type=jnp.float32)
    acc += jnp.dot(xp1[0:H, :].astype(jnp.bfloat16), b1_ref[0],
                   preferred_element_type=jnp.float32)
    acc += jnp.dot(xp1[2:H + 2, :].astype(jnp.bfloat16), b1_ref[2],
                   preferred_element_type=jnp.float32)
    y1 = jnp.maximum(acc + s1_ref[0], 0.0)       # (H, W*Cout) f32

    # ---------------- stage 2: conv3x3 (+folded bias/BN) + ReLU -------------
    xp2[...] = jnp.zeros_like(xp2)
    xp2[1:H + 1, :] = y1

    acc2 = jnp.dot(y1.astype(jnp.bfloat16), b2_ref[1],
                   preferred_element_type=jnp.float32)
    acc2 += jnp.dot(xp2[0:H, :].astype(jnp.bfloat16), b2_ref[0],
                    preferred_element_type=jnp.float32)
    acc2 += jnp.dot(xp2[2:H + 2, :].astype(jnp.bfloat16), b2_ref[2],
                    preferred_element_type=jnp.float32)
    y2 = jnp.maximum(acc2 + s2_ref[0], 0.0)

    o_ref[0] = y2.astype(o_ref.dtype)


def _fold_conv_bn(w_oihw, b, gamma, beta, mean, var, eps):
    """Fold Conv2d bias + eval-mode BatchNorm into scaled weights + a shift."""
    scale = gamma / jnp.sqrt(var + eps)
    w_hwio = jnp.transpose(w_oihw, (2, 3, 1, 0)) * scale[None, None, None, :]
    shift = b * scale + beta - mean * scale
    return w_hwio.astype(jnp.float32), shift.astype(jnp.float32)


def _band_weights(w_hwio, W):
    """(3,3,Cin,Cout) -> (3, W*Cin, W*Cout) block-banded matrices.

    B[dy, sw*Cin+ci, w*Cout+co] = w_hwio[dy, dx, ci, co] when sw == w+dx-1,
    else 0.  Out-of-range taps (W-direction zero padding) are simply absent.
    """
    _, _, Cin, Cout = w_hwio.shape
    dx = jnp.arange(3)[:, None, None]
    sw = jnp.arange(W)[None, :, None]
    ow = jnp.arange(W)[None, None, :]
    sel = (sw == ow + dx - 1).astype(w_hwio.dtype)           # (3, W, W)
    B = jnp.einsum("xsw,yxio->ysiwo", sel, w_hwio)           # (3,W,Cin,W,Cout)
    return B.reshape(3, W * Cin, W * Cout)


def conv_block_forward(x, w1, b1, g1, be1, m1, v1, w2, b2, g2, be2, m2, v2,
                       eps=1e-5):
    """x: (N, Cin, H, W) f32. Returns (N, Cout, H, W) f32 (eval-mode forward)."""
    N, Cin, H, W = x.shape
    Cout = w1.shape[0]

    w1_hwio, shift1 = _fold_conv_bn(w1, b1, g1, be1, m1, v1, eps)
    w2_hwio, shift2 = _fold_conv_bn(w2, b2, g2, be2, m2, v2, eps)
    B1 = _band_weights(w1_hwio, W).astype(jnp.bfloat16)      # (3, W*Cin,  W*Cout)
    B2 = _band_weights(w2_hwio, W).astype(jnp.bfloat16)      # (3, W*Cout, W*Cout)
    s1 = jnp.tile(shift1, W).reshape(1, W * Cout)
    s2 = jnp.tile(shift2, W).reshape(1, W * Cout)

    # NCHW -> lane-dense rows (N, H, W*Cin), bf16 (single fused HBM pass).
    x_rows = jnp.transpose(x, (0, 2, 3, 1)).reshape(N, H, W * Cin)
    x_rows = x_rows.astype(jnp.bfloat16)

    out_rows = pl.pallas_call(
        _conv_block_kernel,
        out_shape=jax.ShapeDtypeStruct((N, H, W * Cout), jnp.float32),
        grid_spec=pltpu.PrefetchScalarGridSpec(
            num_scalar_prefetch=0,
            grid=(N,),
            in_specs=[
                pl.BlockSpec((1, H, W * Cin), lambda n: (n, 0, 0)),
                pl.BlockSpec((3, W * Cin, W * Cout), lambda n: (0, 0, 0)),
                pl.BlockSpec((1, W * Cout), lambda n: (0, 0)),
                pl.BlockSpec((3, W * Cout, W * Cout), lambda n: (0, 0, 0)),
                pl.BlockSpec((1, W * Cout), lambda n: (0, 0)),
            ],
            out_specs=pl.BlockSpec((1, H, W * Cout), lambda n: (n, 0, 0)),
            scratch_shapes=[
                pltpu.VMEM((H + 2, W * Cin), jnp.float32),
                pltpu.VMEM((H + 2, W * Cout), jnp.float32),
            ],
        ),
        compiler_params=pltpu.CompilerParams(
            dimension_semantics=("parallel",)),
    )(x_rows, B1, s1, B2, s2)

    # (N, H, W*Cout) -> (N, Cout, H, W); final transpose kept only to match the
    # PyTorch NCHW contract (a NHWC consumer could skip it entirely).
    return jnp.transpose(out_rows.reshape(N, H, W, Cout), (0, 3, 1, 2))


def _reference(x, w1, b1, g1, be1, m1, v1, w2, b2, g2, be2, m2, v2, eps=1e-5):
    """Eval-mode conv_block forward with the same bf16-matmul/f32-accum numerics."""
    def stage(x_nchw, w_hwio, shift):
        w_oihw = jnp.transpose(w_hwio, (3, 2, 0, 1))
        y = jax.lax.conv_general_dilated(
            x_nchw.astype(jnp.bfloat16), w_oihw.astype(jnp.bfloat16),
            window_strides=(1, 1), padding=((1, 1), (1, 1)),
            dimension_numbers=("NCHW", "OIHW", "NCHW"),
            preferred_element_type=jnp.float32)
        return jnp.maximum(y + shift[None, :, None, None], 0.0)

    w1_hwio, s1 = _fold_conv_bn(w1, b1, g1, be1, m1, v1, eps)
    w2_hwio, s2 = _fold_conv_bn(w2, b2, g2, be2, m2, v2, eps)
    return stage(stage(x, w1_hwio, s1), w2_hwio, s2)


if __name__ == "__main__":
    key = jax.random.PRNGKey(0)
    ch_in, ch_out = 4, 8
    N, H, W = 2, 16, 16

    k = jax.random.split(key, 13)
    x = jax.random.normal(k[0], (N, ch_in, H, W), jnp.float32)
    # Conv1 / BN1 parameters (shapes per nn.Conv2d / nn.BatchNorm2d).
    w1 = jax.random.normal(k[1], (ch_out, ch_in, 3, 3), jnp.float32) * 0.1
    b1 = jax.random.normal(k[2], (ch_out,), jnp.float32) * 0.1
    g1 = 1.0 + 0.1 * jax.random.normal(k[3], (ch_out,), jnp.float32)
    be1 = 0.1 * jax.random.normal(k[4], (ch_out,), jnp.float32)
    m1 = 0.1 * jax.random.normal(k[5], (ch_out,), jnp.float32)
    v1 = jnp.abs(1.0 + 0.1 * jax.random.normal(k[6], (ch_out,), jnp.float32))
    # Conv2 / BN2 parameters.
    w2 = jax.random.normal(k[7], (ch_out, ch_out, 3, 3), jnp.float32) * 0.1
    b2 = jax.random.normal(k[8], (ch_out,), jnp.float32) * 0.1
    g2 = 1.0 + 0.1 * jax.random.normal(k[9], (ch_out,), jnp.float32)
    be2 = 0.1 * jax.random.normal(k[10], (ch_out,), jnp.float32)
    m2 = 0.1 * jax.random.normal(k[11], (ch_out,), jnp.float32)
    v2 = jnp.abs(1.0 + 0.1 * jax.random.normal(k[12], (ch_out,), jnp.float32))

    out = conv_block_forward(x, w1, b1, g1, be1, m1, v1,
                             w2, b2, g2, be2, m2, v2)
    out = jax.block_until_ready(out)

    ref = _reference(x, w1, b1, g1, be1, m1, v1, w2, b2, g2, be2, m2, v2)
    assert out.shape == (N, ch_out, H, W), out.shape
    assert jnp.allclose(out, ref, atol=1e-2, rtol=1e-2), \
        float(jnp.max(jnp.abs(out - ref)))

    print("KERNEL_OK")
</pallas_src>

<mosaic_0001>
module attributes {stable_mosaic.version = 11 : i64} {
  func.func @_conv_block_kernel(%arg0: i32, %arg1: memref<1x16x64xbf16, #tpu.memory_space<vmem>>, %arg2: memref<3x64x128xbf16, #tpu.memory_space<vmem>>, %arg3: memref<1x128xf32, #tpu.memory_space<vmem>>, %arg4: memref<3x128x128xbf16, #tpu.memory_space<vmem>>, %arg5: memref<1x128xf32, #tpu.memory_space<vmem>>, %arg6: memref<1x16x128xf32, #tpu.memory_space<vmem>>, %arg7: memref<18x64xf32, #tpu.memory_space<vmem>>, %arg8: memref<18x128xf32, #tpu.memory_space<vmem>>) attributes {dimension_semantics = [#tpu.dimension_semantics<parallel>], iteration_bounds = array<i64: 2>, scalar_prefetch = 0 : i64, scratch_operands = 2 : i64, tpu.core_type = #tpu.core_type<tc>, window_params = [{transform_indices = @transform_0, window_bounds = array<i64: 1, 16, 64>}, {pipeline_mode = #tpu.pipeline_mode<synchronous>, transform_indices = @transform_1, window_bounds = array<i64: 3, 64, 128>}, {pipeline_mode = #tpu.pipeline_mode<synchronous>, transform_indices = @transform_2, window_bounds = array<i64: 1, 128>}, {pipeline_mode = #tpu.pipeline_mode<synchronous>, transform_indices = @transform_3, window_bounds = array<i64: 3, 128, 128>}, {pipeline_mode = #tpu.pipeline_mode<synchronous>, transform_indices = @transform_4, window_bounds = array<i64: 1, 128>}, {transform_indices = @transform_5, window_bounds = array<i64: 1, 16, 128>}]} {
    %cst = arith.constant 0.000000e+00 : f32
    %0 = vector.broadcast %cst : f32 to vector<18x64xf32>
    %c0 = arith.constant 0 : index
    %c0_0 = arith.constant 0 : index
    %1 = vector.load %arg7[%c0, %c0_0] : memref<18x64xf32, #tpu.memory_space<vmem>>, vector<18x64xf32>
    tpu.vector_store %arg7[%c0, %c0_0], %0 {strides = array<i32>} : memref<18x64xf32, #tpu.memory_space<vmem>>, vector<18x64xf32>,
    %c0_1 = arith.constant 0 : index
    %c0_2 = arith.constant 0 : index
    %c0_3 = arith.constant 0 : index
    %2 = vector.load %arg1[%c0_1, %c0_2, %c0_3] : memref<1x16x64xbf16, #tpu.memory_space<vmem>>, vector<1x16x64xbf16>
    %3 = vector.shape_cast %2 : vector<1x16x64xbf16> to vector<16x64xbf16>
    %4 = arith.extf %3 : vector<16x64xbf16> to vector<16x64xf32>
    %c1 = arith.constant 1 : index
    %c0_4 = arith.constant 0 : index
    %5 = vector.load %arg7[%c1, %c0_4] : memref<18x64xf32, #tpu.memory_space<vmem>>, vector<16x64xf32>
    tpu.vector_store %arg7[%c1, %c0_4], %4 {strides = array<i32>} : memref<18x64xf32, #tpu.memory_space<vmem>>, vector<16x64xf32>,
    %c0_5 = arith.constant 0 : index
    %c0_6 = arith.constant 0 : index
    %c0_7 = arith.constant 0 : index
    %6 = vector.load %arg1[%c0_5, %c0_6, %c0_7] : memref<1x16x64xbf16, #tpu.memory_space<vmem>>, vector<1x16x64xbf16>
    %7 = vector.shape_cast %6 : vector<1x16x64xbf16> to vector<16x64xbf16>
    %c1_8 = arith.constant 1 : index
    %c0_9 = arith.constant 0 : index
    %c0_10 = arith.constant 0 : index
    %8 = vector.load %arg2[%c1_8, %c0_9, %c0_10] : memref<3x64x128xbf16, #tpu.memory_space<vmem>>, vector<1x64x128xbf16>
    %9 = vector.shape_cast %8 : vector<1x64x128xbf16> to vector<64x128xbf16>
    %cst_11 = arith.constant dense<0.000000e+00> : vector<16x128xf32>
    %10 = tpu.matmul %7, %9, %cst_11 {dimension_numbers = #tpu.dot_dimension_numbers<[1], [0], [0], [1], [0, 0, 1, 1], [], []>} : vector<16x64xbf16>, vector<64x128xbf16>, vector<16x128xf32> -> vector<16x128xf32>
    %c0_12 = arith.constant 0 : index
    %c0_13 = arith.constant 0 : index
    %11 = vector.load %arg7[%c0_12, %c0_13] : memref<18x64xf32, #tpu.memory_space<vmem>>, vector<16x64xf32>
    %12 = arith.truncf %11 : vector<16x64xf32> to vector<16x64xbf16>
    %c0_14 = arith.constant 0 : index
    %c0_15 = arith.constant 0 : index
    %c0_16 = arith.constant 0 : index
    %13 = vector.load %arg2[%c0_14, %c0_15, %c0_16] : memref<3x64x128xbf16, #tpu.memory_space<vmem>>, vector<1x64x128xbf16>
    %14 = vector.shape_cast %13 : vector<1x64x128xbf16> to vector<64x128xbf16>
    %cst_17 = arith.constant dense<0.000000e+00> : vector<16x128xf32>
    %15 = tpu.matmul %12, %14, %cst_17 {dimension_numbers = #tpu.dot_dimension_numbers<[1], [0], [0], [1], [0, 0, 1, 1], [], []>} : vector<16x64xbf16>, vector<64x128xbf16>, vector<16x128xf32> -> vector<16x128xf32>
    %16 = arith.addf %10, %15 : vector<16x128xf32>
    %c2 = arith.constant 2 : index
    %c0_18 = arith.constant 0 : index
    %17 = vector.load %arg7[%c2, %c0_18] : memref<18x64xf32, #tpu.memory_space<vmem>>, vector<16x64xf32>
    %18 = arith.truncf %17 : vector<16x64xf32> to vector<16x64xbf16>
    %c2_19 = arith.constant 2 : index
    %c0_20 = arith.constant 0 : index
    %c0_21 = arith.constant 0 : index
    %19 = vector.load %arg2[%c2_19, %c0_20, %c0_21] : memref<3x64x128xbf16, #tpu.memory_space<vmem>>, vector<1x64x128xbf16>
    %20 = vector.shape_cast %19 : vector<1x64x128xbf16> to vector<64x128xbf16>
    %cst_22 = arith.constant dense<0.000000e+00> : vector<16x128xf32>
    %21 = tpu.matmul %18, %20, %cst_22 {dimension_numbers = #tpu.dot_dimension_numbers<[1], [0], [0], [1], [0, 0, 1, 1], [], []>} : vector<16x64xbf16>, vector<64x128xbf16>, vector<16x128xf32> -> vector<16x128xf32>
    %22 = arith.addf %16, %21 : vector<16x128xf32>
    %c0_23 = arith.constant 0 : index
    %c0_24 = arith.constant 0 : index
    %23 = vector.load %arg3[%c0_23, %c0_24] : memref<1x128xf32, #tpu.memory_space<vmem>>, vector<1x128xf32>
    %24 = vector.shape_cast %23 : vector<1x128xf32> to vector<128xf32>
    %25 = vector.shape_cast %24 : vector<128xf32> to vector<1x128xf32>
    %26 = vector.broadcast %25 : vector<1x128xf32> to vector<16x128xf32>
    %27 = arith.addf %22, %26 : vector<16x128xf32>
    %cst_25 = arith.constant 0.000000e+00 : f32
    %28 = vector.broadcast %cst_25 : f32 to vector<16x128xf32>
    %29 = arith.maximumf %27, %28 : vector<16x128xf32>
    %cst_26 = arith.constant 0.000000e+00 : f32
    %30 = vector.broadcast %cst_26 : f32 to vector<18x128xf32>
    %c0_27 = arith.constant 0 : index
    %c0_28 = arith.constant 0 : index
    %31 = vector.load %arg8[%c0_27, %c0_28] : memref<18x128xf32, #tpu.memory_space<vmem>>, vector<18x128xf32>
    tpu.vector_store %arg8[%c0_27, %c0_28], %30 {strides = array<i32>} : memref<18x128xf32, #tpu.memory_space<vmem>>, vector<18x128xf32>,
    %c1_29 = arith.constant 1 : index
    %c0_30 = arith.constant 0 : index
    %32 = vector.load %arg8[%c1_29, %c0_30] : memref<18x128xf32, #tpu.memory_space<vmem>>, vector<16x128xf32>
    tpu.vector_store %arg8[%c1_29, %c0_30], %29 {strides = array<i32>} : memref<18x128xf32, #tpu.memory_space<vmem>>, vector<16x128xf32>,
    %33 = arith.truncf %29 : vector<16x128xf32> to vector<16x128xbf16>
    %c1_31 = arith.constant 1 : index
    %c0_32 = arith.constant 0 : index
    %c0_33 = arith.constant 0 : index
    %34 = vector.load %arg4[%c1_31, %c0_32, %c0_33] : memref<3x128x128xbf16, #tpu.memory_space<vmem>>, vector<1x128x128xbf16>
    %35 = vector.shape_cast %34 : vector<1x128x128xbf16> to vector<128x128xbf16>
    %cst_34 = arith.constant dense<0.000000e+00> : vector<16x128xf32>
    %36 = tpu.matmul %33, %35, %cst_34 {dimension_numbers = #tpu.dot_dimension_numbers<[1], [0], [0], [1], [0, 0, 1, 1], [], []>} : vector<16x128xbf16>, vector<128x128xbf16>, vector<16x128xf32> -> vector<16x128xf32>
    %c0_35 = arith.constant 0 : index
    %c0_36 = arith.constant 0 : index
    %37 = vector.load %arg8[%c0_35, %c0_36] : memref<18x128xf32, #tpu.memory_space<vmem>>, vector<16x128xf32>
    %38 = arith.truncf %37 : vector<16x128xf32> to vector<16x128xbf16>
    %c0_37 = arith.constant 0 : index
    %c0_38 = arith.constant 0 : index
    %c0_39 = arith.constant 0 : index
    %39 = vector.load %arg4[%c0_37, %c0_38, %c0_39] : memref<3x128x128xbf16, #tpu.memory_space<vmem>>, vector<1x128x128xbf16>
    %40 = vector.shape_cast %39 : vector<1x128x128xbf16> to vector<128x128xbf16>
    %cst_40 = arith.constant dense<0.000000e+00> : vector<16x128xf32>
    %41 = tpu.matmul %38, %40, %cst_40 {dimension_numbers = #tpu.dot_dimension_numbers<[1], [0], [0], [1], [0, 0, 1, 1], [], []>} : vector<16x128xbf16>, vector<128x128xbf16>, vector<16x128xf32> -> vector<16x128xf32>
    %42 = arith.addf %36, %41 : vector<16x128xf32>
    %c2_41 = arith.constant 2 : index
    %c0_42 = arith.constant 0 : index
    %43 = vector.load %arg8[%c2_41, %c0_42] : memref<18x128xf32, #tpu.memory_space<vmem>>, vector<16x128xf32>
    %44 = arith.truncf %43 : vector<16x128xf32> to vector<16x128xbf16>
    %c2_43 = arith.constant 2 : index
    %c0_44 = arith.constant 0 : index
    %c0_45 = arith.constant 0 : index
    %45 = vector.load %arg4[%c2_43, %c0_44, %c0_45] : memref<3x128x128xbf16, #tpu.memory_space<vmem>>, vector<1x128x128xbf16>
    %46 = vector.shape_cast %45 : vector<1x128x128xbf16> to vector<128x128xbf16>
    %cst_46 = arith.constant dense<0.000000e+00> : vector<16x128xf32>
    %47 = tpu.matmul %44, %46, %cst_46 {dimension_numbers = #tpu.dot_dimension_numbers<[1], [0], [0], [1], [0, 0, 1, 1], [], []>} : vector<16x128xbf16>, vector<128x128xbf16>, vector<16x128xf32> -> vector<16x128xf32>
    %48 = arith.addf %42, %47 : vector<16x128xf32>
    %c0_47 = arith.constant 0 : index
    %c0_48 = arith.constant 0 : index
    %49 = vector.load %arg5[%c0_47, %c0_48] : memref<1x128xf32, #tpu.memory_space<vmem>>, vector<1x128xf32>
    %50 = vector.shape_cast %49 : vector<1x128xf32> to vector<128xf32>
    %51 = vector.shape_cast %50 : vector<128xf32> to vector<1x128xf32>
    %52 = vector.broadcast %51 : vector<1x128xf32> to vector<16x128xf32>
    %53 = arith.addf %48, %52 : vector<16x128xf32>
    %cst_49 = arith.constant 0.000000e+00 : f32
    %54 = vector.broadcast %cst_49 : f32 to vector<16x128xf32>
    %55 = arith.maximumf %53, %54 : vector<16x128xf32>
    %c0_50 = arith.constant 0 : index
    %c0_51 = arith.constant 0 : index
    %c0_52 = arith.constant 0 : index
    %56 = vector.load %arg6[%c0_50, %c0_51, %c0_52] : memref<1x16x128xf32, #tpu.memory_space<vmem>>, vector<1x16x128xf32>
    %57 = vector.shape_cast %56 : vector<1x16x128xf32> to vector<16x128xf32>
    %58 = vector.shape_cast %55 : vector<16x128xf32> to vector<1x16x128xf32>
    tpu.vector_store %arg6[%c0_50, %c0_51, %c0_52], %58 {strides = array<i32>} : memref<1x16x128xf32, #tpu.memory_space<vmem>>, vector<1x16x128xf32>,
    return
  }
  func.func @transform_0(%arg0: i32) -> (i32, i32, i32) {
    %c0_i32 = arith.constant 0 : i32
    %c0_i32_0 = arith.constant 0 : i32
    %c0_i32_1 = arith.constant 0 : i32
    return %arg0, %c0_i32, %c0_i32_0 : i32, i32, i32
  }
  func.func @transform_1(%arg0: i32) -> (i32, i32, i32) {
    %c0_i32 = arith.constant 0 : i32
    %c0_i32_0 = arith.constant 0 : i32
    %c0_i32_1 = arith.constant 0 : i32
    %c0_i32_2 = arith.constant 0 : i32
    return %c0_i32, %c0_i32_0, %c0_i32_1 : i32, i32, i32
  }
  func.func @transform_2(%arg0: i32) -> (i32, i32) {
    %c0_i32 = arith.constant 0 : i32
    %c0_i32_0 = arith.constant 0 : i32
    %c0_i32_1 = arith.constant 0 : i32
    return %c0_i32, %c0_i32_0 : i32, i32
  }
  func.func @transform_3(%arg0: i32) -> (i32, i32, i32) {
    %c0_i32 = arith.constant 0 : i32
    %c0_i32_0 = arith.constant 0 : i32
    %c0_i32_1 = arith.constant 0 : i32
    %c0_i32_2 = arith.constant 0 : i32
    return %c0_i32, %c0_i32_0, %c0_i32_1 : i32, i32, i32
  }
  func.func @transform_4(%arg0: i32) -> (i32, i32) {
    %c0_i32 = arith.constant 0 : i32
    %c0_i32_0 = arith.constant 0 : i32
    %c0_i32_1 = arith.constant 0 : i32
    return %c0_i32, %c0_i32_0 : i32, i32
  }
  func.func @transform_5(%arg0: i32) -> (i32, i32, i32) {
    %c0_i32 = arith.constant 0 : i32
    %c0_i32_0 = arith.constant 0 : i32
    %c0_i32_1 = arith.constant 0 : i32
    return %arg0, %c0_i32, %c0_i32_0 : i32, i32, i32
  }
}

</mosaic_0001>

<bundles_post_ra>
// kernel: tpu_custom_call.1
= control target key start
LH: loop header
LB: loop body
LE: loop exit
PB: predicated region body
PF: predicated region fallthrough
CT: control target
= control target key end

     0   :  { %10 = vsyncpa [#allocation5], 0  ;;  %s1763_s0 = inlined_call_operand.hbm [shape: bf16[2,16,64], index: 0, kind: input, shape index: {}]   ;;  %s1764_s1 = inlined_call_operand.hbm [shape: bf16[3,64,128], index: 1, kind: input, shape index: {}]   ;;  %s1765_s2 = inlined_call_operand.vmem [shape: f32[1,128], index: 2, kind: input, shape index: {}]   ;;  %s1766_s3 = inlined_call_operand.hbm [shape: bf16[3,128,128], index: 3, kind: input, shape index: {}]   ;;  %s1767_s4 = inlined_call_operand.vmem [shape: f32[1,128], index: 4, kind: input, shape index: {}]   ;;  %s1768_s5 = inlined_call_operand.hbm [shape: f32[2,16,128], index: 5, kind: output, shape index: {}]  }
   0x1   :  { %12 = vsyncpa [#allocation5 + $0x1], 0 }
   0x2   :  { %13 = vsyncpa [#allocation8], 0 }
   0x3   :  { %14 = vsyncpa [#allocation6], 0 }
   0x4   :  { %16 = vsyncpa [#allocation6 + $0x1], 0  ;;  %s1494_s18 = smov 0   ;;  %s1496_s19 = smov 0  }
   0x5   :  { %s1498_s20 = smov 0   ;;  %s1500_s21 = smov 0  }
   0x6 LB: > { %s1515_s22 = sadd.s32 4294967295, %s1452_s21   ;;  %s990_s23 = sadd.s32 4294967294, %s1452_s21   ;;  %s1452_s21 = sphi %s1500_s21, %s1791_s21   ;;  %s1448_s20 = sphi %s1498_s20, %s1790_s20   ;;  %s1444_s19 = sphi %s1496_s19, %s1789_s19   ;;  %s1440_s18 = sphi %s1494_s18, %s1788_s18  }
   0x7   : > { %p42_p0 = scmp.ne.s32.totalorder %s1444_s19, %s1440_s18  ;;  %p1769_p1 = scmp.eq.s32.totalorder %s1515_s22, 0 }
   0x8   : > { %p150_p2 = scmp.eq.s32.totalorder %s1515_s22, 1  ;;  %p156_p3 = scmp.eq.s32.totalorder %s990_s23, 1 }
   0x9   : > { %p1524_p4 = por %p1769_p1, %p42_p0  ;;  %p991_p5 = scmp.ge.s32.totalorder %s1452_s21, 1 }
   0xa   : > { %p1529_p6 = por %p156_p3, %p42_p0  ;;  %p163_p7 = scmp.lt.s32.totalorder %s1452_s21, 3 }
   0xb   : > { %s1774_s24 = scalar_select %p1524_p4, 1, 0 }
   0xc   : > { %s1775_s25 = scalar_select %p1529_p6, 1, 0 }
   0xd   : > { %p1534_p8 = pnand %p991_p5, %p163_p7  ;;  %s1454_s27 = smov [#allocation7]  }
   0xe   : > { %s175_s28 = sshll.u32 %s1454_s27, 4  ;;  %s1455_s30 = smov [#allocation9]   ;;  %s176_s28 = int_to_ptr.vmem [resolvable:$true] %s175_s28 }
   0xf   : > { %s1776_s26 = scalar_select %p1534_p8, 1, 0 }
  0x10   : > { %p1206_p9 = pneg %p1534_p8  ;;  %s191_s6 = sshll.u32 %s1455_s30, 4  ;;  %s192_s6 = int_to_ptr.vmem [resolvable:$true] %s191_s6 }
  0x11   : > { %s1315_s7 = scalar_lea.vmem %s176_s28, 1536  ;;  %p1323_p5 = scmp.lt.s32.totalorder %s176_s28, %s176_s28 }
  0x12   : > { %p1543_p11 = pnand %p1206_p9, %p1769_p1  ;;  %p1316_p13 = scmp.ne.s32.totalorder %s176_s28, %s1315_s7 }
  0x13   : > { %p1324_p7 = scmp.lt.s32.totalorder %s1315_s7, %s1315_s7 }
  0x14   : > { %p1306_p12 = pneg %p1543_p11 }
  0x15   : > { %p1325_p10 = por %p1324_p7, %p1323_p5 }
  0x16   : > { %p1318_p0 = pnand %p1316_p13, %p1306_p12 }
  0x18   : > { %p1319_p3 = pneg %p1318_p0 }
  0x1a   : > { %p1326_p9 = pnand %p1325_p10, %p1319_p3 }
  0x1c   : > { %1329 = shalt.err (!%p1326_p9)
}
  0x1d   : > { %s1770_s8 = smov 64   ;;  %s1457_s9 = smov 4  }
  0x1e   : > { %1209 = dma.hbm_to_vmem [thread:$0]  (!%p1543_p11), %s1764_s1, 1536, %s176_s28, [#allocation8], %s1770_s8, %s1770_s8, %s1457_s9  }
  0x1f   : > { %s1341_s12 = scalar_lea.vmem %s192_s6, 3072  ;;  %p1349_p10 = scmp.lt.s32.totalorder %s192_s6, %s192_s6 }
  0x20   : > { %p1342_p13 = scmp.ne.s32.totalorder %s192_s6, %s1341_s12  ;;  %p1350_p3 = scmp.lt.s32.totalorder %s1341_s12, %s1341_s12 }
  0x22   : > { %p1344_p0 = pnand %p1342_p13, %p1306_p12  ;;  %p1351_p7 = por %p1350_p3, %p1349_p10 }
  0x24   : > { %p1345_p5 = pneg %p1344_p0 }
  0x26   : > { %p1352_p9 = pnand %p1351_p7, %p1345_p5 }
  0x28   : > { %1355 = shalt.err (!%p1352_p9)
}
  0x29   : > { %1212 = dma.hbm_to_vmem [thread:$0]  (!%p1543_p11), %s1766_s3, 3072, %s192_s6, [#allocation8], %s1770_s8, %s1770_s8, %s1457_s9  }
  0x2a   : > { %s1572_s15 = sadd.s32 1, %s1452_s21   ;;  %s29_s16 = sadd.s32 1, %s1448_s20 }
  0x2b   : > { %s26_s17 = ssub.s32 %s1452_s21, %s1572_s15  ;;  %p36_p12 = scmp.ne.s32.totalorder %s1448_s20, %s1444_s19 }
  0x2c   : > { %p27_p13 = scmp.eq.s32.totalorder %s26_s17, 0  ;;  %p37_p0 = scmp.eq.s32.totalorder %s1452_s21, 0 }
  0x2d   : > { %p1582_p5 = por %p150_p2, %p36_p12  ;;  %p1223_p10 = scmp.lt.s32.totalorder %s1452_s21, 2 }
  0x2e   : > { %s1588_s27 = scalar_select %p27_p13, %s1448_s20, %s29_s16  }
  0x2f   : > { %s1778_s23 = scalar_select %p1582_p5, 1, 0 }
  0x30   : > { %p38_p3 = por %p37_p0, %p36_p12  ;;  %s208_s28 = sand.u32 1, %s1448_s20  }
  0x31   : > { %s995_s29 = sshll.u32 %s208_s28, 3  ;;  %s1050_s30 = sshll.u32 %s1452_s21, 7 }
  0x32   : > { %s1595_s10 = scalar_lea.hbm %s1763_s0, %s1050_s30  ;;  %s212_s11 = scalar_lea.vmem [#allocation4], %s995_s29 }
  0x33   : > { %s219_s12 = sshll.u32 %s212_s11, 4  ;;  %p1599_p2 = pnand %p1223_p10, %p38_p3  ;;  %s1597_s12 = int_to_ptr.vmem [resolvable:$true] %s219_s12 }
  0x34   : > { %s1603_s14 = scalar_lea.sflag [#allocation5], %s208_s28  ;;  %s1356_s16 = scalar_lea.hbm %s1595_s10, 128 }
  0x35   : > { %p1357_p11 = scmp.ne.s32.totalorder %s1595_s10, %s1356_s16  ;;  %p1358_p7 = pneg %p1599_p2 }
  0x36   : > { %s1361_s29 = scalar_lea.hbm %s1763_s0, 256  ;;  %p1362_p13 = scmp.lt.s32.totalorder %s1595_s10, %s1763_s0 }
  0x37   : > { %p1359_p9 = pnand %p1358_p7, %p1357_p11  ;;  %p1363_p0 = scmp.lt.s32.totalorder %s1361_s29, %s1356_s16 }
  0x39   : > { %p1360_p12 = pneg %p1359_p9  ;;  %p1364_p10 = por %p1363_p0, %p1362_p13 }
  0x3b   : > { %p1365_p3 = pnand %p1364_p10, %p1360_p12 }
  0x3d   : > { %1368 = shalt.err (!%p1365_p3)
}
  0x3e   : > { %s1369_s28 = scalar_lea.vmem %s1597_s12, 128  ;;  %s1458_s11 = smov [#allocation4]  }
  0x3f   : > { %p1370_p1 = scmp.ne.s32.totalorder %s1597_s12, %s1369_s28  ;;  %s1374_s8 = sshll.u32 %s1458_s11, 4  ;;  %s1375_s8 = int_to_ptr.vmem [resolvable:$false] %s1374_s8 }
  0x40   : > { %s1376_s17 = scalar_lea.vmem %s1375_s8, 256  ;;  %p1377_p9 = scmp.lt.s32.totalorder %s1597_s12, %s1375_s8 }
  0x41   : > { %p1372_p6 = pnand %p1370_p1, %p1358_p7  ;;  %p1378_p5 = scmp.lt.s32.totalorder %s1376_s17, %s1369_s28 }
  0x43   : > { %p1373_p11 = pneg %p1372_p6  ;;  %p1379_p4 = por %p1378_p5, %p1377_p9 }
  0x45   : > { %p1380_p8 = pnand %p1379_p4, %p1373_p11 }
  0x47   : > { %1383 = shalt.err (!%p1380_p8)
}
  0x48   : > { %s1780_s16 = smov 64   ;;  %p1781_p1 = scmp.ne.s32.totalorder %s1776_s26, 0 }
  0x49   : > { %1216 = dma.hbm_to_vmem [thread:$0]  (!%p1599_p2), %s1595_s10, 128, %s1597_s12, %s1603_s14, %s1780_s16, %s1780_s16, %s1457_s9  }
  0x4a   : > { %231 = sbr.rel (%p1781_p1) target bundleno = 579 (0x243), region = 40  ;;  %s1630_s30 = sand.u32 (!%p1781_p1), 1, %s1444_s19  }
  0x4b   : > { %s999_s8 = sshll.u32 (!%p1781_p1), %s1630_s30, 3  ;;  %s234_s29 = scalar_lea.sflag (!%p1781_p1), [#allocation5], %s1630_s30 }
  0x4c   : > { %s1634_s6 = scalar_lea.vmem (!%p1781_p1), [#allocation4], %s999_s8  ;;  %p1782_p4 = scmp.ne.s32.totalorder (!%p1781_p1), %s1774_s24, 0 }
  0x4f   : > { %1427 = dma.done.wait (%p1782_p4), %s234_s29, 128  }
  0x50   : > { %1429 = vsyncadd (%p1782_p4), %s234_s29, 4294967168  ;;  %p1783_p6 = scmp.eq.s32.totalorder %s1515_s22, 0 }
  0x52   : > { %1431 = dma.done.wait (%p1783_p6), [#allocation8], 4608   ;;  %p1784_p8 = pmov %p1783_p6 }
  0x53   : > { %vm273_vm0 = vcmask 523264   ;;  %vm276_vm1 = vcmask 517120   ;;  %v1459_v0 = vmov 0.0   ;;  %vm1460_vm2 = vmmov 0   ;;  %v1267_v1 = vld [vmem:[#allocation7 + $0x18] sm:$0xff]   ;;  %v1269_v3 = vld [vmem:[#allocation7 + $0x10] sm:$0xff]  }
  0x54   : > { %1433 = vsyncadd (%p1784_p8), [#allocation8], 4294962688  ;;  %1098 = vmatprep.subr.bf16.mxu0 %v1459_v0  ;;  %540 = vst [vmem:[#allocation3] sm:$0xff] %v1459_v0  ;;  %1110 = vmatprep.subr.bf16.mxu1 %v1459_v0  ;;  %v1268_v2 = vld [vmem:[#allocation7 + $0x38] sm:$0xff]   ;;  %v1270_v4 = vld [vmem:[#allocation7 + $0x30] sm:$0xff]   ;;  %s1002_s9 = sshll.u32 %s1630_s30, 4 }
  0x55   : > { %541 = vst [vmem:[#allocation3 + $0x8] sm:$0xff] %v1459_v0  ;;  %542 = vst [vmem:[#allocation3 + $0x10] sm:$0x3] %v1459_v0  ;;  %1106 = vmatprep.mubr.msk.bf16.mxu0 %vm1460_vm2, %v1459_v0  ;;  %1118 = vmatprep.mubr.msk.bf16.mxu1 %vm1460_vm2, %v1459_v0  ;;  %v1271_v5 = vld [vmem:[#allocation7 + $0x8] sm:$0xff]   ;;  %v1053_v7 = vld [vmem:[%s1634_s6] sm:$0xff]   ;;  %s271_s13 = scalar_lea.vmem [#allocation10], %s1002_s9 }
  0x56   : > { %274 = vst.msk [vmem:[#allocation2] sm:$0xff] %vm273_vm0, %v1459_v0  ;;  %275 = vst.msk [vmem:[#allocation2 + $0x8] sm:$0xff] %vm273_vm0, %v1459_v0  ;;  %1099 = vmatpush3.bf16.msra.mxu0 %v1267_v1  ;;  %1111 = vmatpush3.bf16.msra.mxu1 %v1268_v2  ;;  %v1272_v6 = vld [vmem:[#allocation7 + $0x28] sm:$0xff]   ;;  %v1054_v8 = vunpack.c.l.bf16 %v1053_v7  ;;  %v1055_v9 = vunpack.c.h.bf16 %v1053_v7  ;;  %v1273_v10 = vld [vmem:[#allocation7] sm:$0xff]   ;;  %s898_s14 = sshll.u32 %s271_s13, 4  ;;  %s1051_s7 = sshll.u32 %s1515_s22, 8  ;;  %s1715_s14 = int_to_ptr.vmem [resolvable:$true] %s898_s14 }
  0x57   : > { %277 = vst.msk [vmem:[#allocation2 + $0x10] sm:$0x3] %vm276_vm1, %v1459_v0  ;;  %1100 = vmatprep.subr.bf16.mxu0 %v1459_v0  ;;  %1112 = vmatprep.subr.bf16.mxu1 %v1459_v0  ;;  %v1274_v11 = vld [vmem:[#allocation7 + $0x20] sm:$0xff]   ;;  %v1275_v12 = vld [vmem:[%s1634_s6] sm:$0xff]   ;;  %v1278_v18 = vld [vmem:[#allocation7 + $0x48] sm:$0xff]   ;;  %s1720_s17 = scalar_lea.hbm %s1768_s5, %s1051_s7  ;;  %s885_s16 = scalar_lea.sflag [#allocation6], %s1630_s30 }
  0x58   : > { %282 = vst.msk [vmem:[#allocation2 + $0x1] sm:$0xff] %vm273_vm0, %v1054_v8  ;;  %283 = vst.msk [vmem:[#allocation2 + $0x9] sm:$0xff] %vm273_vm0, %v1055_v9  ;;  %v1276_v15 = vld [vmem:[#allocation7 + $0x58] sm:$0xff]   ;;  %v1277_v17 = vld [vmem:[#allocation7 + $0x50] sm:$0xff]   ;;  %s1384_s8 = scalar_lea.vmem %s1715_s14, 256  ;;  %p1785_p2 = scmp.ne.s32.totalorder %s1778_s23, 0 }
  0x59   : > { %v1279_v19 = vld [vmem:[#allocation7 + $0x40] sm:$0xff]   ;;  %v1280_v23 = vld [vmem:[#allocation9 + $0x78] sm:$0xff]   ;;  %v1281_v24 = vld [vmem:[#allocation9 + $0x70] sm:$0xff]   ;;  %p1385_p5 = scmp.ne.s32.totalorder %s1715_s14, %s1384_s8  ;;  %s1461_s22 = smov [#allocation10]  }
  0x5a   : > { %1101 = vmatpush3.bf16.msra.mxu0 %v1269_v3  ;;  %1113 = vmatpush3.bf16.msra.mxu1 %v1270_v4  ;;  %v1282_v25 = vld [vmem:[#allocation9 + $0x38] sm:$0xff]   ;;  %v1283_v26 = vld [vmem:[#allocation9 + $0x68] sm:$0xff]   ;;  %v1284_v27 = vld [vmem:[#allocation9 + $0x30] sm:$0xff]   ;;  %s1388_s29 = sshll.u32 %s1461_s22, 4  ;;  %s1389_s29 = int_to_ptr.vmem [resolvable:$false] %s1388_s29 }
  0x5b   : > { %1102 = vmatprep.subr.bf16.mxu0 %v1459_v0  ;;  %1114 = vmatprep.subr.bf16.mxu1 %v1459_v0  ;;  %v1285_v28 = vld [vmem:[#allocation9 + $0x60] sm:$0xff]   ;;  %v1286_v29 = vld [vmem:[#allocation9 + $0x28] sm:$0xff]   ;;  %v1287_v30 = vld [vmem:[#allocation9 + $0x58] sm:$0xff]   ;;  %p1386_p7 = pnand %p1385_p5, %p1785_p2  ;;  %s1390_s6 = scalar_lea.vmem %s1389_s29, 512 }
  0x5c   : > { %v1288_v31 = vld [vmem:[#allocation9 + $0x20] sm:$0xff]   ;;  %v1289_v32 = vld [vmem:[#allocation9 + $0x50] sm:$0xff]   ;;  %v1290_v33 = vld [vmem:[#allocation9 + $0x18] sm:$0xff]   ;;  %p1391_p13 = scmp.lt.s32.totalorder %s1715_s14, %s1389_s29  ;;  %p1392_p0 = scmp.lt.s32.totalorder %s1390_s6, %s1384_s8 }
  0x5d   : > { %v1291_v34 = vld [vmem:[#allocation9 + $0x48] sm:$0xff]   ;;  %v1292_v35 = vld [vmem:[#allocation9 + $0x10] sm:$0xff]   ;;  %v1293_v36 = vld [vmem:[#allocation9 + $0x40] sm:$0xff]   ;;  %p1387_p12 = pneg %p1386_p7 }
  0x5e   : > { %1103 = vmatpush3.bf16.msra.mxu0 %v1271_v5  ;;  %1115 = vmatpush3.bf16.msra.mxu1 %v1272_v6  ;;  %v1294_v37 = vld [vmem:[#allocation9 + $0x8] sm:$0xff]   ;;  %v1295_v38 = vld [vmem:[#allocation9] sm:$0xff]   ;;  %v1296_v63 = vld [vmem:[#allocation9 + $0xb8] sm:$0xff]   ;;  %p1393_p10 = por %p1392_p0, %p1391_p13 }
  0x5f   : > { %1104 = vmatprep.subr.bf16.mxu0 %v1459_v0  ;;  %1116 = vmatprep.subr.bf16.mxu1 %v1459_v0  ;;  %v295_v13 = vld [vmem:[#allocation2] sm:$0xff]  ;;  %v296_v14 = vld [vmem:[#allocation2 + $0x8] sm:$0xff]  ;;  %v1297_v2 = vld [vmem:[#allocation9 + $0xb0] sm:$0xff]  }
  0x60   : > { %v297_v16 = vpack.c.bf16 %v296_v14, %v295_v13  ;;  %v447_v20 = vld [vmem:[#allocation2 + $0x2] sm:$0xff]  ;;  %v448_v21 = vld [vmem:[#allocation2 + $0xa] sm:$0xff]  ;;  %v1019_v49 = vld [vmem:[%s1765_s2] ss:$0 sm:$0xff]  ;;  %p1394_p3 = pnand %p1393_p10, %p1387_p12 }
  0x61   : > { %v449_v22 = vpack.c.bf16 %v448_v21, %v447_v20  ;;  %v1298_v3 = vld [vmem:[#allocation9 + $0xa8] sm:$0xff]   ;;  %v1299_v4 = vld [vmem:[#allocation9 + $0xa0] sm:$0xff]   ;;  %v1300_v5 = vld [vmem:[#allocation9 + $0x98] sm:$0xff]  }
  0x62   : > { %1105 = vmatpush3.bf16.msra.mxu0 %v1273_v10  ;;  %1117 = vmatpush3.bf16.msra.mxu1 %v1274_v11  ;;  %v1301_v6 = vld [vmem:[#allocation9 + $0x90] sm:$0xff]   ;;  %v1302_v7 = vld [vmem:[#allocation9 + $0x88] sm:$0xff]   ;;  %v1303_v8 = vld [vmem:[#allocation9 + $0x80] sm:$0xff]  }
  0x63   : > { %1122 = vmatprep.subr.bf16.mxu0 %v1459_v0  ;;  %1134 = vmatprep.subr.bf16.mxu1 %v1459_v0 }
  0x65   : > { %1119 = vmatmul.mubr.msk.bf16.vlgmr.msra.gmra.mxu1 %vm273_vm0, %v1275_v12  ;;  %1107 = vmatmul.mubr.msk.bf16.vlgmr.msra.gmra.mxu0 %vm273_vm0, %v297_v16 }
  0x66   : > { %1150 = vmatprep.mubr.msk.bf16.mxu1 %vm1460_vm2, %v1459_v0  ;;  %1123 = vmatpush3.bf16.msra.mxu0 %v1276_v15 }
  0x67   : > { %1130 = vmatprep.mubr.msk.bf16.mxu0 %vm1460_vm2, %v1459_v0  ;;  %1124 = vmatprep.subr.bf16.mxu0 %v1459_v0 }
  0x68   : > { %1135 = vmatpush3.bf16.msra.mxu1 %v1282_v25 }
  0x69   : > { %1136 = vmatprep.subr.bf16.mxu1 %v1459_v0 }
  0x6a   : > { %1125 = vmatpush3.bf16.msra.mxu0 %v1277_v17 }
  0x6b   : > { %1126 = vmatprep.subr.bf16.mxu0 %v1459_v0 }
  0x6c   : > { %1137 = vmatpush3.bf16.msra.mxu1 %v1284_v27 }
  0x6d   : > { %1138 = vmatprep.subr.bf16.mxu1 %v1459_v0 }
  0x6e   : > { %1127 = vmatpush3.bf16.msra.mxu0 %v1278_v18 }
  0x6f   : > { %1128 = vmatprep.subr.bf16.mxu0 %v1459_v0 }
  0x70   : > { %1139 = vmatpush3.bf16.msra.mxu1 %v1286_v29 }
  0x71   : > { %1140 = vmatprep.subr.bf16.mxu1 %v1459_v0 }
  0x72   : > { %1129 = vmatpush3.bf16.msra.mxu0 %v1279_v19 }
  0x73   : > { %1154 = vmatprep.subr.bf16.mxu0 %v1459_v0 }
  0x74   : > { %1141 = vmatpush3.bf16.msra.mxu1 %v1288_v31 }
  0x75   : > { %1131 = vmatmul.mubr.msk.bf16.vlgmr.msra.gmra.mxu0 %vm273_vm0, %v449_v22  ;;  %1142 = vmatprep.subr.bf16.mxu1 %v1459_v0 }
  0x76   : > { %1155 = vmatpush3.bf16.msra.mxu0 %v1280_v23  ;;  %1170 = vmatprep.mubr.msk.bf16.mxu0 %vm1460_vm2, %v1459_v0 }
  0x77   : > { %1156 = vmatprep.subr.bf16.mxu0 %v1459_v0 }
  0x78   : > { %1143 = vmatpush3.bf16.msra.mxu1 %v1290_v33 }
  0x79   : > { %1144 = vmatprep.subr.bf16.mxu1 %v1459_v0 }
  0x7a   : > { %1157 = vmatpush3.bf16.msra.mxu0 %v1281_v24 }
  0x7b   : > { %1158 = vmatprep.subr.bf16.mxu0 %v1459_v0 }
  0x7c   : > { %1145 = vmatpush3.bf16.msra.mxu1 %v1292_v35 }
  0x7d   : > { %1146 = vmatprep.subr.bf16.mxu1 %v1459_v0 }
  0x7e   : > { %1159 = vmatpush3.bf16.msra.mxu0 %v1283_v26 }
  0x7f   : > { %1160 = vmatprep.subr.bf16.mxu0 %v1459_v0 }
  0x80   : > { %1147 = vmatpush3.bf16.msra.mxu1 %v1294_v37 }
  0x81   : > { %1148 = vmatprep.subr.bf16.mxu1 %v1459_v0 }
  0x82   : > { %1161 = vmatpush3.bf16.msra.mxu0 %v1285_v28 }
  0x83   : > { %1162 = vmatprep.subr.bf16.mxu0 %v1459_v0 }
  0x84   : > { %1149 = vmatpush3.bf16.msra.mxu1 %v1295_v38 }
  0x85   : > { %1174 = vmatprep.subr.bf16.mxu1 %v1459_v0 }
  0x86   : > { %1163 = vmatpush3.bf16.msra.mxu0 %v1287_v30 }
  0x87   : > { %1164 = vmatprep.subr.bf16.mxu0 %v1459_v0 }
  0x8a   : > { %1165 = vmatpush3.bf16.msra.mxu0 %v1289_v32 }
  0x8b   : > { %1166 = vmatprep.subr.bf16.mxu0 %v1459_v0 }
  0x8e   : > { %1167 = vmatpush3.bf16.msra.mxu0 %v1291_v34 }
  0x8f   : > { %1168 = vmatprep.subr.bf16.mxu0 %v1459_v0 }
  0x92   : > { %1169 = vmatpush3.bf16.msra.mxu0 %v1293_v36 }
 0x125   : > { %v440_v39 = vpop.f32.mrf.mxu1  ;;  %v367_v41 = vpop.f32.mrf.mxu0 }
 0x126   : > { %v441_v47 = vadd.f32 %v440_v39, %v367_v41 }
 0x127   : > { %v1120_v40 = vpop.f32.mrf.mxu1  ;;  %v1108_v43 = vpop.f32.mrf.mxu0 }
 0x129   : > { %v443_v42 = vpop.f32.mrf.mxu1  ;;  %v370_v45 = vpop.f32.mrf.mxu0 }
 0x12a   : > { %v444_v52 = vadd.f32 %v443_v42, %v370_v45 }
 0x12b   : > { %v1121_v44 = vpop.f32.mrf.mxu1  ;;  %v1109_v46 = vpop.f32.mrf.mxu0 }
 0x135   : > { %v520_v48 = vpop.f32.mrf.mxu0 }
 0x136   : > { %v527_v50 = vadd.f32 %v520_v48, %v441_v47 }
 0x137   : > { %v1132_v51 = vpop.f32.mrf.mxu0 }
 0x138   : > { %v536_v53 = vadd.f32 %v1019_v49, %v527_v50 }
 0x139   : > { %v523_v54 = vpop.f32.mrf.mxu0 }
 0x13a   : > { %v538_v55 = vmax.f32 %v536_v53, 0.0  ;;  %v528_v56 = vadd.f32 %v523_v54, %v444_v52 }
 0x13b   : > { %v1133_v57 = vpop.f32.mrf.mxu0 }
 0x13c   : > { %543 = vst [vmem:[#allocation3 + $0x1] sm:$0xff] %v538_v55  ;;  %v537_v58 = vadd.f32 %v1019_v49, %v528_v56 }
 0x13e   : > { %v539_v59 = vmax.f32 %v537_v58, 0.0 }
 0x140   : > { %544 = vst [vmem:[#allocation3 + $0x9] sm:$0xff] %v539_v59  ;;  %v545_v60 = vpack.c.bf16 %v539_v59, %v538_v55 }
 0x142   : > { %1171 = vmatmul.mubr.bf16.vlgmr.msra.gmra.mxu0 %v545_v60 }
 0x143   : > { %v563_v61 = vld [vmem:[#allocation3] sm:$0xff] }
 0x147   : > { %v564_v62 = vld [vmem:[#allocation3 + $0x8] sm:$0xff] }
 0x148   : > { %v565_v1 = vpack.c.bf16 %v564_v62, %v563_v61  ;;  %v760_v9 = vld [vmem:[#allocation3 + $0x2] sm:$0xff]  ;;  %v761_v10 = vld [vmem:[#allocation3 + $0xa] sm:$0xff] }
 0x149   : > { %v762_v11 = vpack.c.bf16 %v761_v10, %v760_v9 }
 0x14a   : > { %1151 = vmatmul.mubr.bf16.vlgmr.msra.gmra.mxu1 %v565_v1 }
 0x14b   : > { %1175 = vmatpush3.bf16.msra.mxu1 %v1296_v63  ;;  %1190 = vmatprep.mubr.msk.bf16.mxu1 %vm1460_vm2, %v1459_v0 }
 0x14c   : > { %1176 = vmatprep.subr.bf16.mxu1 %v1459_v0 }
 0x14f   : > { %1177 = vmatpush3.bf16.msra.mxu1 %v1297_v2 }
 0x150   : > { %1178 = vmatprep.subr.bf16.mxu1 %v1459_v0 }
 0x153   : > { %1179 = vmatpush3.bf16.msra.mxu1 %v1298_v3 }
 0x154   : > { %1180 = vmatprep.subr.bf16.mxu1 %v1459_v0 }
 0x157   : > { %1181 = vmatpush3.bf16.msra.mxu1 %v1299_v4 }
 0x158   : > { %1182 = vmatprep.subr.bf16.mxu1 %v1459_v0 }
 0x15b   : > { %1183 = vmatpush3.bf16.msra.mxu1 %v1300_v5 }
 0x15c   : > { %1184 = vmatprep.subr.bf16.mxu1 %v1459_v0 }
 0x15f   : > { %1185 = vmatpush3.bf16.msra.mxu1 %v1301_v6 }
 0x160   : > { %1186 = vmatprep.subr.bf16.mxu1 %v1459_v0 }
 0x163   : > { %1187 = vmatpush3.bf16.msra.mxu1 %v1302_v7 }
 0x164   : > { %1188 = vmatprep.subr.bf16.mxu1 %v1459_v0  ;;  %v1044_v0 = vld [vmem:[%s1767_s4] ss:$0 sm:$0xff] }
 0x167   : > { %1189 = vmatpush3.bf16.msra.mxu1 %v1303_v8 }
 0x16a   : > { %1191 = vmatmul.mubr.bf16.vlgmr.msra.gmra.mxu1 %v762_v11 }
 0x202   : > { %v753_v12 = vpop.f32.mrf.mxu0 }
 0x204   : > { %v1172_v13 = vpop.f32.mrf.mxu0 }
 0x206   : > { %v756_v14 = vpop.f32.mrf.mxu0 }
 0x208   : > { %v1173_v15 = vpop.f32.mrf.mxu0 }
 0x20a   : > { %v664_v16 = vpop.f32.mrf.mxu1 }
 0x20b   : > { %v754_v20 = vadd.f32 %v753_v12, %v664_v16 }
 0x20c   : > { %v1152_v17 = vpop.f32.mrf.mxu1 }
 0x20e   : > { %v667_v18 = vpop.f32.mrf.mxu1 }
 0x20f   : > { %v757_v24 = vadd.f32 %v756_v14, %v667_v18 }
 0x210   : > { %v1153_v19 = vpop.f32.mrf.mxu1 }
 0x22a   : > { %v862_v21 = vpop.f32.mrf.mxu1 }
 0x22b   : > { %v869_v22 = vadd.f32 %v862_v21, %v754_v20 }
 0x22c   : > { %v1192_v23 = vpop.f32.mrf.mxu1 }
 0x22d   : > { %v878_v25 = vadd.f32 %v1044_v0, %v869_v22 }
 0x22e   : > { %v865_v26 = vpop.f32.mrf.mxu1 }
 0x22f   : > { %v880_v27 = vmax.f32 %v878_v25, 0.0  ;;  %v870_v28 = vadd.f32 %v865_v26, %v757_v24 }
 0x230   : > { %v1193_v29 = vpop.f32.mrf.mxu1 }
 0x231   : > { %882 = vst [vmem:[%s271_s13] sm:$0xff] %v880_v27  ;;  %v879_v30 = vadd.f32 %v1044_v0, %v870_v28 }
 0x233   : > { %v881_v31 = vmax.f32 %v879_v30, 0.0 }
 0x235   : > { %883 = vst [vmem:[%s271_s13 + $0x8] sm:$0xff] %v881_v31 }
 0x236   : > { %1397 = shalt.err (!%p1394_p3)
}
 0x237   : > { %s1398_s24 = scalar_lea.hbm %s1720_s17, 256  ;;  %s1402_s10 = scalar_lea.hbm %s1768_s5, 512 }
 0x238   : > { %p1399_p11 = scmp.ne.s32.totalorder %s1720_s17, %s1398_s24  ;;  %p1403_p4 = scmp.lt.s32.totalorder %s1720_s17, %s1768_s5 }
 0x239   : > { %p1404_p6 = scmp.lt.s32.totalorder %s1402_s10, %s1398_s24 }
 0x23a   : > { %p1400_p9 = pnand %p1399_p11, %p1785_p2 }
 0x23b   : > { %p1405_p8 = por %p1404_p6, %p1403_p4 }
 0x23c   : > { %p1401_p1 = pneg %p1400_p9 }
 0x23e   : > { %p1406_p5 = pnand %p1405_p8, %p1401_p1 }
 0x240   : > { %1409 = shalt.err (!%p1406_p5)
}
 0x241   : > { %s1462_s7 = smov 128   ;;  %s1463_s28 = smov 8  }
 0x242   : > { %1204 = dma.vmem_to_hbm [thread:$0]  (%p1785_p2), %s1715_s14, 256, %s1720_s17, %s885_s16, %s1462_s7, %s1462_s7, %s1463_s28  }
 0x243 PF: > { %s913_s11 = sand.u32 1, %s1440_s18   ;;  %p1786_p7 = scmp.ne.s32.totalorder %s1775_s25, 0 }
 0x244   : > { %p1787_p12 = scmp.ge.s32.totalorder %s1452_s21, 2  ;;  %s914_s8 = scalar_lea.sflag [#allocation6], %s913_s11 }
 0x246   : > { %p1218_p13 = pnand %p1787_p12, %p1786_p7 }
 0x248   : > { %p1219_p0 = pneg %p1218_p13 }
 0x24a   : > { %1435 = dma.done.wait (%p1219_p0), %s914_s8, 256  }
 0x24b   : > { %1437 = vsyncadd (%p1219_p0), %s914_s8, 4294967040  ;;  %p19_p10 = scmp.ge.s32.totalorder %s1572_s15, 4   ;;  %s1788_s18 = smov %s1444_s19 }
 0x24c   : > { %s1789_s19 = smov %s1448_s20  ;;  %s1790_s20 = smov %s1588_s27 }
 0x24d   : > { %s1791_s21 = smov %s1572_s15  ;;  %21 = sbr.rel (!%p19_p10) target bundleno = 6 (0x6), region = 97 }
 0x252   :  { %919 = vsyncpa [#allocation5], 1 }
 0x253   :  { %921 = vsyncpa [#allocation5 + $0x1], 1 }
 0x254   :  { %922 = vsyncpa [#allocation8], 1 }
 0x255   :  { %923 = vsyncpa [#allocation6], 1 }
 0x256   :  { %925 = vsyncpa [#allocation6 + $0x1], 1 }

</bundles_post_ra>
